<compile_context>
chip_gen: v7x
topology: tpu7x:2x2x1
jax: 0.10.0
libtpu: 0.0.40
codegen_flags: <defaults>
</compile_context>

<pallas_src>
import functools

import jax
import jax.numpy as jnp
from jax.experimental import pallas as pl
from jax.experimental.pallas import tpu as pltpu

_LANES = 128
_SUBLANES = 8


def _round_up(x, m):
    return ((x + m - 1) // m) * m


# ----------------------------------------------------------------------------
# Kernel 1: tiled global avg/max pooling over the flattened spatial axis.
# ----------------------------------------------------------------------------
def _accum_chunks_unmasked(x_ref, sum_acc, max_acc, chunk_ids):
    """Per-128-lane-chunk ref loads; pairwise combine before accumulator RMW."""
    i, n = 0, len(chunk_ids)
    while i < n:
        k = chunk_ids[i]
        a = x_ref[:, k * _LANES:(k + 1) * _LANES].astype(jnp.float32)
        if i + 1 < n:
            k2 = chunk_ids[i + 1]
            b = x_ref[:, k2 * _LANES:(k2 + 1) * _LANES].astype(jnp.float32)
            part_sum = a + b
            part_max = jnp.maximum(a, b)
            i += 2
        else:
            part_sum = a
            part_max = a
            i += 1
        sum_acc[...] = sum_acc[...] + part_sum
        max_acc[...] = jnp.maximum(max_acc[...], part_max)


def _pool_kernel(x_ref, out_ref, sum_acc, max_acc, *, s_tile, true_s):
    s = pl.program_id(1)
    n_chunks = s_tile // _LANES
    rem = true_s % s_tile            # valid lanes in the last S tile (0 => full)
    needs_mask = rem != 0

    @pl.when(s == 0)
    def _init():
        sum_acc[...] = jnp.zeros_like(sum_acc)
        max_acc[...] = jnp.full_like(max_acc, -jnp.inf)

    if not needs_mask:
        # Every tile is fully valid: single unmasked path.
        _accum_chunks_unmasked(x_ref, sum_acc, max_acc, list(range(n_chunks)))
    else:
        last = pl.num_programs(1) - 1
        full_chunks = rem // _LANES   # fully valid chunks in the last tile
        partial = rem % _LANES        # valid lanes of the single partial chunk

        @pl.when(s != last)
        def _steady():                # unmasked fast path (no iota/select/where)
            _accum_chunks_unmasked(x_ref, sum_acc, max_acc, list(range(n_chunks)))

        @pl.when(s == last)
        def _ragged_tail():
            if full_chunks > 0:
                _accum_chunks_unmasked(x_ref, sum_acc, max_acc,
                                       list(range(full_chunks)))
            if partial > 0:
                xk = x_ref[:, full_chunks * _LANES:(full_chunks + 1) * _LANES]
                xk = xk.astype(jnp.float32)
                col = jax.lax.broadcasted_iota(jnp.int32, xk.shape, 1)
                valid = col < partial
                sum_acc[...] = sum_acc[...] + jnp.where(valid, xk, 0.0)
                max_acc[...] = jnp.maximum(max_acc[...],
                                           jnp.where(valid, xk, -jnp.inf))
            # Chunks past `rem` are never touched (no compute, no mask work).

    @pl.when(s == pl.num_programs(1) - 1)
    def _finalize():
        # One cross-lane (XLU) reduce per row block, only at the very end.
        avg = jnp.sum(sum_acc[...], axis=1, keepdims=True) * (1.0 / true_s)
        mx = jnp.max(max_acc[...], axis=1, keepdims=True)
        out_ref[:, 0:1] = avg.astype(out_ref.dtype)   # lane 0: avg pool
        out_ref[:, 1:2] = mx.astype(out_ref.dtype)    # lane 1: max pool


# ----------------------------------------------------------------------------
# Kernel 2: bottleneck MLP on stacked [avg; max] pools + sigmoid. Runs once.
# ----------------------------------------------------------------------------
def _mlp_kernel(pools_ref, w1_ref, b1_ref, w2_ref, b2_ref, o_ref, *, batch):
    pools = pools_ref[...].astype(jnp.float32)           # (2B, C)
    w1 = w1_ref[...].astype(jnp.float32)                 # (C, M)
    b1 = b1_ref[...].astype(jnp.float32)                 # (1, M)
    w2 = w2_ref[...].astype(jnp.float32)                 # (M, C)
    b2 = b2_ref[...].astype(jnp.float32)                 # (1, C)

    h = jnp.dot(pools, w1, preferred_element_type=jnp.float32) + b1
    h = jnp.where(h >= 0, h, 0.2 * h)                    # LeakyReLU(0.2)
    y = jnp.dot(h, w2, preferred_element_type=jnp.float32) + b2

    logits = y[:batch, :] + y[batch:, :]                 # avg branch + max branch
    o_ref[...] = jax.nn.sigmoid(logits).astype(o_ref.dtype)


# ----------------------------------------------------------------------------
# Wrapper
# ----------------------------------------------------------------------------
def channel_attention(x, w1, b1, w2, b2, *, s_tile=None, max_row_block=512):
    """x: (B, C, H, W). Returns sigmoid attention of shape (B, C, 1, 1)."""
    B, C, H, W = x.shape
    S = H * W
    R = B * C
    M = w1.shape[1]

    x_flat = x.reshape(R, S)   # contiguous reshape: no data movement

    # --- tile sizing ---------------------------------------------------------
    if s_tile is None:
        # bf16: larger S tile keeps per-step DMA ~4 MiB (amortizes per-step
        # pipeline overhead); still only ~8 MiB double-buffered.
        s_tile = 4096 if x.dtype == jnp.bfloat16 else 2048
    s_tile = min(_round_up(s_tile, _LANES), _round_up(S, _LANES))
    num_s = pl.cdiv(S, s_tile)

    # Target >= 2 row blocks (both v7x TensorCores) while keeping blocks large;
    # no padding — Pallas handles the ragged last row block.
    target_rows = min(max_row_block, max(_SUBLANES, pl.cdiv(R, 2)))
    row_block = min(_round_up(target_rows, _SUBLANES), _round_up(R, _SUBLANES))
    num_r = pl.cdiv(R, row_block)

    pool_kernel = functools.partial(_pool_kernel, s_tile=s_tile, true_s=S)

    pooled = pl.pallas_call(
        pool_kernel,
        # Packed output: lane 0 = avg, lane 1 = max (single writeback per block).
        out_shape=jax.ShapeDtypeStruct((R, 2), jnp.float32),
        grid_spec=pltpu.PrefetchScalarGridSpec(
            num_scalar_prefetch=0,
            grid=(num_r, num_s),
            in_specs=[pl.BlockSpec((row_block, s_tile), lambda r, s: (r, s))],
            out_specs=pl.BlockSpec((row_block, 2), lambda r, s: (r, 0)),
            scratch_shapes=[pltpu.VMEM((row_block, _LANES), jnp.float32),
                            pltpu.VMEM((row_block, _LANES), jnp.float32)]),
        compiler_params=pltpu.CompilerParams(
            # Row blocks are independent -> parallel; S axis is a reduction.
            dimension_semantics=("parallel", "arbitrary"),
            vmem_limit_bytes=32 * 1024 * 1024),
    )(x_flat)

    # Tiny layout plumbing on B*C values: (R, 2) -> stacked (2B, C) for the MLP.
    avg_pool = pooled[:, 0].reshape(B, C)
    max_pool = pooled[:, 1].reshape(B, C)
    pools = jnp.concatenate([avg_pool, max_pool], axis=0)

    mlp_kernel = functools.partial(_mlp_kernel, batch=B)
    out = pl.pallas_call(
        mlp_kernel,
        out_shape=jax.ShapeDtypeStruct((B, C), x.dtype),
        in_specs=[
            pl.BlockSpec((2 * B, C), lambda: (0, 0)),
            pl.BlockSpec((C, M), lambda: (0, 0)),
            pl.BlockSpec((1, M), lambda: (0, 0)),
            pl.BlockSpec((M, C), lambda: (0, 0)),
            pl.BlockSpec((1, C), lambda: (0, 0)),
        ],
        out_specs=pl.BlockSpec((B, C), lambda: (0, 0)),
    )(pools, w1, b1.reshape(1, M), w2, b2.reshape(1, C))

    return out.reshape(B, C, 1, 1)


def init_params(key, n_channels_in, reduction_ratio):
    """Deterministic init mimicking nn.Linear default (uniform(-1/sqrt(fan_in), .))."""
    middle = int(n_channels_in / float(reduction_ratio))
    k1, k2, k3, k4 = jax.random.split(key, 4)
    bound1 = 1.0 / (n_channels_in ** 0.5)
    bound2 = 1.0 / (middle ** 0.5)
    # Weights stored already transposed for y = x @ W + b
    w1 = jax.random.uniform(k1, (n_channels_in, middle), jnp.float32, -bound1, bound1)
    b1 = jax.random.uniform(k2, (middle,), jnp.float32, -bound1, bound1)
    w2 = jax.random.uniform(k3, (middle, n_channels_in), jnp.float32, -bound2, bound2)
    b2 = jax.random.uniform(k4, (n_channels_in,), jnp.float32, -bound2, bound2)
    return w1, b1, w2, b2


def _reference(x, w1, b1, w2, b2):
    avg = jnp.mean(x, axis=(2, 3))
    mx = jnp.max(x, axis=(2, 3))

    def bck(p):
        h = p @ w1 + b1
        h = jnp.where(h >= 0, h, 0.2 * h)
        return h @ w2 + b2

    return jax.nn.sigmoid(bck(avg) + bck(mx)).reshape(x.shape[0], x.shape[1], 1, 1)


if __name__ == "__main__":
    key = jax.random.PRNGKey(0)
    kx1, kx2, kp = jax.random.split(key, 3)

    C, reduction_ratio = 4, 2
    w1, b1, w2, b2 = init_params(kp, C, reduction_ratio)

    # Case 1: multi-step S axis (init/accumulate/finalize path), no masking.
    x1 = jax.random.normal(kx1, (2, C, 16, 16), dtype=jnp.float32)
    out1 = jax.block_until_ready(channel_attention(x1, w1, b1, w2, b2, s_tile=128))
    ref1 = _reference(x1, w1, b1, w2, b2)
    assert out1.shape == (2, C, 1, 1)
    assert jnp.allclose(out1, ref1, atol=1e-5, rtol=1e-5)

    # Case 2: S < lane width (masked partial chunk) and a ragged last row block.
    x2 = jax.random.normal(kx2, (3, C, 7, 9), dtype=jnp.float32)
    out2 = jax.block_until_ready(channel_attention(x2, w1, b1, w2, b2))
    ref2 = _reference(x2, w1, b1, w2, b2)
    assert out2.shape == (3, C, 1, 1)
    assert jnp.allclose(out2, ref2, atol=1e-5, rtol=1e-5)

    print("KERNEL_OK")
</pallas_src>

<mosaic_0001>
module attributes {stable_mosaic.version = 11 : i64} {
  func.func @_pool_kernel(%arg0: i32, %arg1: i32, %arg2: memref<8x128xf32, #tpu.memory_space<vmem>>, %arg3: memref<8x2xf32, #tpu.memory_space<vmem>>, %arg4: memref<8x128xf32, #tpu.memory_space<vmem>>, %arg5: memref<8x128xf32, #tpu.memory_space<vmem>>) attributes {dimension_semantics = [#tpu.dimension_semantics<parallel>, #tpu.dimension_semantics<arbitrary>], iteration_bounds = array<i64: 1, 2>, scalar_prefetch = 0 : i64, scratch_operands = 2 : i64, tpu.core_type = #tpu.core_type<tc>, window_params = [{transform_indices = @transform_0, window_bounds = array<i64: 8, 128>}, {transform_indices = @transform_1, window_bounds = array<i64: 8, 2>}]} {
    %c0_i32 = arith.constant 0 : i32
    %0 = arith.cmpi eq, %arg1, %c0_i32 : i32
    %1 = arith.extui %0 : i1 to i32
    %c0_i32_0 = arith.constant 0 : i32
    %2 = arith.cmpi ne, %1, %c0_i32_0 : i32
    scf.if %2 {
      %cst = arith.constant 0.000000e+00 : f32
      %13 = vector.broadcast %cst : f32 to vector<8x128xf32>
      %c0_11 = arith.constant 0 : index
      %c0_12 = arith.constant 0 : index
      %14 = vector.load %arg4[%c0_11, %c0_12] : memref<8x128xf32, #tpu.memory_space<vmem>>, vector<8x128xf32>
      tpu.vector_store %arg4[%c0_11, %c0_12], %13 {strides = array<i32>} : memref<8x128xf32, #tpu.memory_space<vmem>>, vector<8x128xf32>,
      %cst_13 = arith.constant 0xFF800000 : f32
      %15 = vector.broadcast %cst_13 : f32 to vector<8x128xf32>
      %c0_14 = arith.constant 0 : index
      %c0_15 = arith.constant 0 : index
      %16 = vector.load %arg5[%c0_14, %c0_15] : memref<8x128xf32, #tpu.memory_space<vmem>>, vector<8x128xf32>
      tpu.vector_store %arg5[%c0_14, %c0_15], %15 {strides = array<i32>} : memref<8x128xf32, #tpu.memory_space<vmem>>, vector<8x128xf32>,
    } else {
    }
    %c0 = arith.constant 0 : index
    %c0_1 = arith.constant 0 : index
    %3 = vector.load %arg2[%c0, %c0_1] : memref<8x128xf32, #tpu.memory_space<vmem>>, vector<8x128xf32>
    %c0_2 = arith.constant 0 : index
    %c0_3 = arith.constant 0 : index
    %4 = vector.load %arg4[%c0_2, %c0_3] : memref<8x128xf32, #tpu.memory_space<vmem>>, vector<8x128xf32>
    %5 = arith.addf %4, %3 : vector<8x128xf32>
    %c0_4 = arith.constant 0 : index
    %c0_5 = arith.constant 0 : index
    %6 = vector.load %arg4[%c0_4, %c0_5] : memref<8x128xf32, #tpu.memory_space<vmem>>, vector<8x128xf32>
    tpu.vector_store %arg4[%c0_4, %c0_5], %5 {strides = array<i32>} : memref<8x128xf32, #tpu.memory_space<vmem>>, vector<8x128xf32>,
    %c0_6 = arith.constant 0 : index
    %c0_7 = arith.constant 0 : index
    %7 = vector.load %arg5[%c0_6, %c0_7] : memref<8x128xf32, #tpu.memory_space<vmem>>, vector<8x128xf32>
    %8 = arith.maximumf %7, %3 : vector<8x128xf32>
    %c0_8 = arith.constant 0 : index
    %c0_9 = arith.constant 0 : index
    %9 = vector.load %arg5[%c0_8, %c0_9] : memref<8x128xf32, #tpu.memory_space<vmem>>, vector<8x128xf32>
    tpu.vector_store %arg5[%c0_8, %c0_9], %8 {strides = array<i32>} : memref<8x128xf32, #tpu.memory_space<vmem>>, vector<8x128xf32>,
    %c1_i32 = arith.constant 1 : i32
    %10 = arith.cmpi eq, %arg1, %c1_i32 : i32
    %11 = arith.extui %10 : i1 to i32
    %c0_i32_10 = arith.constant 0 : i32
    %12 = arith.cmpi ne, %11, %c0_i32_10 : i32
    scf.if %12 {
      %c0_11 = arith.constant 0 : index
      %c0_12 = arith.constant 0 : index
      %13 = vector.load %arg4[%c0_11, %c0_12] : memref<8x128xf32, #tpu.memory_space<vmem>>, vector<8x128xf32>
      %cst = arith.constant dense<0.000000e+00> : vector<8xf32>
      %14 = vector.multi_reduction <add>, %13, %cst [1] : vector<8x128xf32> to vector<8xf32>
      %15 = vector.shape_cast %14 : vector<8xf32> to vector<8x1xf32>
      %cst_13 = arith.constant 3.906250e-03 : f32
      %16 = vector.broadcast %cst_13 : f32 to vector<8x1xf32>
      %17 = arith.mulf %15, %16 : vector<8x1xf32>
      %c0_14 = arith.constant 0 : index
      %c0_15 = arith.constant 0 : index
      %18 = vector.load %arg5[%c0_14, %c0_15] : memref<8x128xf32, #tpu.memory_space<vmem>>, vector<8x128xf32>
      %cst_16 = arith.constant dense<0xFF800000> : vector<8xf32>
      %19 = vector.multi_reduction <maximumf>, %18, %cst_16 [1] : vector<8x128xf32> to vector<8xf32>
      %20 = vector.shape_cast %19 : vector<8xf32> to vector<8x1xf32>
      %c0_17 = arith.constant 0 : index
      %c0_18 = arith.constant 0 : index
      %21 = vector.load %arg3[%c0_17, %c0_18] : memref<8x2xf32, #tpu.memory_space<vmem>>, vector<8x1xf32>
      tpu.vector_store %arg3[%c0_17, %c0_18], %17 {strides = array<i32>} : memref<8x2xf32, #tpu.memory_space<vmem>>, vector<8x1xf32>,
      %c0_19 = arith.constant 0 : index
      %c1 = arith.constant 1 : index
      %22 = vector.load %arg3[%c0_19, %c1] : memref<8x2xf32, #tpu.memory_space<vmem>>, vector<8x1xf32>
      tpu.vector_store %arg3[%c0_19, %c1], %20 {strides = array<i32>} : memref<8x2xf32, #tpu.memory_space<vmem>>, vector<8x1xf32>,
    } else {
    }
    return
  }
  func.func @transform_0(%arg0: i32, %arg1: i32) -> (i32, i32) {
    %c0_i32 = arith.constant 0 : i32
    return %arg0, %arg1 : i32, i32
  }
  func.func @transform_1(%arg0: i32, %arg1: i32) -> (i32, i32) {
    %c0_i32 = arith.constant 0 : i32
    %c0_i32_0 = arith.constant 0 : i32
    return %arg0, %c0_i32 : i32, i32
  }
}

</mosaic_0001>

<bundles_post_ra>
// kernel: tpu_custom_call.1
= control target key start
LH: loop header
LB: loop body
LE: loop exit
PB: predicated region body
PF: predicated region fallthrough
CT: control target
= control target key end

     0   :  { %6 = vsyncpa [#allocation5], 0  ;;  %s540_s0 = inlined_call_operand.hbm [shape: f32[8,256], index: 0, kind: input, shape index: {}]   ;;  %s541_s1 = inlined_call_operand.vmem [shape: f32[8,2], index: 1, kind: output, shape index: {}]  }
   0x1   :  { %8 = vsyncpa [#allocation5 + $0x1], 0  ;;  %s412_s6 = smov 0   ;;  %s414_s7 = smov 0  }
   0x2   :  { %s416_s8 = smov 0   ;;  %s418_s9 = smov 0  }
   0x3   :  { %s420_s10 = smov 0   ;;  %s422_s11 = smov 0  }
   0x4 LB: > { %s248_s12 = sadd.s32 4294967295, %s397_s11   ;;  %s23_s13 = sadd.s32 1, %s393_s10  ;;  %s397_s11 = sphi %s422_s11, %s14_s11   ;;  %s393_s10 = sphi %s420_s10, %s551_s10   ;;  %s389_s9 = sphi %s418_s9, %s550_s9   ;;  %s385_s8 = sphi %s416_s8, %s549_s8   ;;  %s381_s7 = sphi %s414_s7, %s548_s7   ;;  %s377_s6 = sphi %s412_s6, %s547_s6  }
   0x5   : > { %p24_p0 = scmp.ge.s32.totalorder %s23_s13, 2  ;;  %s35_s14 = sadd.s32 1, %s385_s8 }
   0x6   : > { %p42_p1 = scmp.ne.s32.totalorder %s385_s8, %s381_s7  ;;  %p43_p2 = scmp.eq.s32.totalorder %s397_s11, 0 }
   0x7   : > { %s553_s13 = smov (%p24_p0, %s23_s13), 0  ;;  %p48_p4 = scmp.ne.s32.totalorder %s381_s7, %s377_s6 }
   0x8   : > { %p448_p3 = por %p43_p2, %p42_p1  ;;  %s31_s16 = ssub.s32 %s393_s10, %s553_s13 }
   0x9   : > { %p49_p5 = scmp.eq.s32.totalorder %s248_s12, 0  ;;  %p33_p6 = scmp.eq.s32.totalorder %s31_s16, 0 }
   0xa   : > { %p266_p8 = scmp.lt.s32.totalorder %s397_s11, 2  ;;  %s98_s19 = sand.u32 1, %s385_s8  }
   0xb   : > { %p455_p7 = por %p49_p5, %p48_p4  ;;  %s252_s20 = sshll.u32 %s393_s10, 7 }
   0xc   : > { %s461_s18 = scalar_select %p33_p6, %s385_s8, %s35_s14  }
   0xd   : > { %s251_s21 = sshll.u32 %s98_s19, 3  ;;  %s468_s24 = scalar_lea.hbm %s540_s0, %s252_s20 }
   0xe   : > { %s102_s25 = scalar_lea.vmem [#allocation4], %s251_s21  ;;  %p472_p9 = pnand %p266_p8, %p448_p3 }
   0xf   : > { %s111_s26 = sshll.u32 %s102_s25, 4  ;;  %s99_s28 = scalar_lea.sflag [#allocation5], %s98_s19  ;;  %s476_s26 = int_to_ptr.vmem [resolvable:$true] %s111_s26 }
  0x10   : > { %s317_s29 = scalar_lea.hbm %s468_s24, 128  ;;  %p319_p13 = pneg %p472_p9 }
  0x11   : > { %p318_p12 = scmp.ne.s32.totalorder %s468_s24, %s317_s29  ;;  %s322_s3 = scalar_lea.hbm %s540_s0, 256 }
  0x12   : > { %p323_p2 = scmp.lt.u32.totalorder %s468_s24, %s540_s0  ;;  %p324_p3 = scmp.lt.u32.totalorder %s322_s3, %s317_s29 }
  0x13   : > { %p320_p0 = pnand %p319_p13, %p318_p12  ;;  %p326_p5 = scmp.lt.u32.totalorder %s317_s29, %s468_s24 }
  0x14   : > { %p325_p4 = por %p324_p3, %p323_p2 }
  0x15   : > { %p321_p1 = pneg %p320_p0 }
  0x16   : > { %p327_p6 = por %p326_p5, %p325_p4 }
  0x18   : > { %p328_p8 = pnand %p327_p6, %p321_p1 }
  0x1a   : > { %331 = shalt.err (!%p328_p8)
}
  0x1b   : > { %s332_s6 = scalar_lea.vmem %s476_s26, 128  ;;  %s399_s12 = smov [#allocation4]  }
  0x1c   : > { %p333_p12 = scmp.ne.s32.totalorder %s476_s26, %s332_s6  ;;  %s337_s14 = sshll.u32 %s399_s12, 4  ;;  %s338_s14 = int_to_ptr.vmem [resolvable:$false] %s337_s14 }
  0x1d   : > { %s339_s15 = scalar_lea.vmem %s338_s14, 256  ;;  %p340_p11 = scmp.lt.s32.totalorder %s476_s26, %s338_s14 }
  0x1e   : > { %p335_p0 = pnand %p333_p12, %p319_p13  ;;  %p341_p2 = scmp.lt.s32.totalorder %s339_s15, %s332_s6 }
  0x20   : > { %p336_p10 = pneg %p335_p0  ;;  %p342_p3 = por %p341_p2, %p340_p11 }
  0x22   : > { %p343_p4 = pnand %p342_p3, %p336_p10 }
  0x24   : > { %346 = shalt.err (!%p343_p4)
}
  0x25   : > { %265 = dma.hbm_to_vmem [thread:$0]  (!%p472_p9), %s468_s24, 128, %s476_s26, %s99_s28  }
  0x26   : > { %p545_p1 = scmp.lt.s32.totalorder %s397_s11, 3  ;;  %p546_p5 = scmp.ge.s32.totalorder %s397_s11, 1 }
  0x28   : > { %p117_p13 = pnand %p546_p5, %p545_p1 }
  0x29   : > { %s122_s16 = sand.u32 (!%p117_p13), 1, %s381_s7  }
  0x2a   : > { %120 = sbr.rel (%p117_p13) target bundleno = 217 (0xd9), region = 24  ;;  %s254_s19 = sshll.u32 (!%p117_p13), %s122_s16, 3 }
  0x2b   : > { %s123_s20 = scalar_lea.sflag (!%p117_p13), [#allocation5], %s122_s16  ;;  %s126_s21 = scalar_lea.vmem (!%p117_p13), [#allocation4], %s254_s19 }
  0x31   : > { %372 = dma.done.wait (%p455_p7), %s123_s20, 128  }
  0x32   : > { %374 = vsyncadd (%p455_p7), %s123_s20, 4294967168  ;;  %p255_p10 = scmp.ne.s32.totalorder %s389_s9, 0 }
  0x33   : > { %v400_v0 = vmov (!%p255_p10), 0.0   ;;  %v401_v1 = vmov (!%p255_p10), -inf  }
  0x34   : > { %151 = sbr.rel (%p255_p10) target bundleno = 59 (0x3b), region = 32  ;;  %152 = vst [vmem:[#allocation2] sm:$0xff] (!%p255_p10), %v400_v0  ;;  %153 = vst [vmem:[#allocation3] sm:$0xff] (!%p255_p10), %v401_v1 }
  0x3b PF: > { %v154_v2 = vld [vmem:[%s126_s21] sm:$0xff]  ;;  %v155_v3 = vld [vmem:[#allocation2] sm:$0xff]  ;;  %v158_v4 = vld [vmem:[#allocation3] sm:$0xff]  ;;  %p256_p9 = scmp.ne.s32.totalorder %s389_s9, 1 }
  0x3c   : > { %v156_v5 = vadd.f32 %v155_v3, %v154_v2  ;;  %v159_v6 = vmax.f32 %v158_v4, %v154_v2  ;;  %vm172_vm0 = vcmask (!%p256_p9), 7168   ;;  %vm174_vm1 = vcmask (!%p256_p9), 15368  }
  0x3d   : > { %164 = sbr.rel (%p256_p9) target bundleno = 217 (0xd9), region = 36 }
  0x3e   : > { %157 = vst [vmem:[#allocation2] sm:$0xff] %v156_v5  ;;  %160 = vst [vmem:[#allocation3] sm:$0xff] %v159_v6 }
  0x45   : > { %v165_v7 = vld [vmem:[#allocation2] sm:$0xff]  ;;  %v169_v8 = vld [vmem:[#allocation3] sm:$0xff] }
  0x46   : > { %166 = vadd.xlane.f32.xlu0 %v165_v7 }
  0x4a   : > { %170 = vmax.xlane.f32.xlu0 %v169_v8 }
  0xd3   : > { %v167_v9 = vpop.xlane.xlu0 %166 }
  0xd4   : > { %v168_v10 = vmul.f32 0.00390625, %v167_v9 }
  0xd6   : > { %173 = vst.msk [vmem:[%s541_s1] sm:$0xff] %vm172_vm0, %v168_v10 }
  0xd7   : > { %v171_v11 = vpop.xlane.xlu0 %170 }
  0xd8   : > { %175 = vst.msk [vmem:[%s541_s1] sm:$0xff] %vm174_vm1, %v171_v11 }
  0xd9 PF: > { %s14_s11 = sadd.s32 1, %s397_s11   ;;  %s547_s6 = smov %s381_s7 }
  0xda   : > { %p11_p7 = scmp.ge.s32.totalorder %s14_s11, 4   ;;  %s548_s7 = smov %s385_s8 }
  0xdb   : > { %s549_s8 = smov %s461_s18  ;;  %s550_s9 = smov %s393_s10 }
  0xdc   : > { %s551_s10 = smov %s553_s13  ;;  %13 = sbr.rel (!%p11_p7) target bundleno = 4 (0x4), region = 72 }
  0xe3   :  { %195 = vsyncpa [#allocation5], 1 }
  0xe4   :  { %197 = vsyncpa [#allocation5 + $0x1], 1 }

</bundles_post_ra>
